<compile_context>
chip_gen: v6e
topology: v6e:2x2x1
jax: 0.10.0
libtpu: 0.0.40
codegen_flags: <defaults>
</compile_context>

<pallas_src>
import functools

import jax
import jax.numpy as jnp
from jax.experimental import pallas as pl
from jax.experimental.pallas import tpu as pltpu

_NEG_BIG = -1e30  # finite "minus infinity" -> no inf/NaN propagation in f32 math


def _round_up(x, m):
    return ((x + m - 1) // m) * m


def _vmem_capacity_bytes():
    """Physical VMEM per TensorCore, with safe fallbacks."""
    try:
        cap = int(pltpu.get_tpu_info().vmem_capacity_bytes)
        if cap > 0:
            return cap
    except Exception:
        pass
    kind = ""
    try:
        kind = jax.devices()[0].device_kind.lower()
    except Exception:
        pass
    return (64 << 20) if "v7" in kind else (128 << 20)


def _vmem_estimate(tq, tk, Dp, isz):
    feat = 2 * (tq + tk) * Dp * isz          # double-buffered anchor/key tiles
    temps = 10 * tq * tk * 4                 # logits tile + mask/exp temporaries (f32)
    scratch = 4 * tq * 128 * 4               # (tq,1) f32 accumulators, lane padded
    small = 4 * tq * 128 * 4 + 4 * 8 * tk * 4  # labels + output blocks
    return feat + temps + scratch + small


def _choose_tiles(B, Dp, isz, budget, block):
    """Pick (tq, tk, Bp): lane-dense tk, tq as large as the VMEM budget allows."""
    headroom = (budget * 7) // 8
    if block is not None:
        blk = max(8, _round_up(min(int(block), B), 8))
        single = _round_up(B, 8)
        if blk >= single:
            return single, single, single
        tk = _round_up(blk, 128)             # multi-tile columns must be lane dense
        Bp = _round_up(B, tk)
        return tk, tk, Bp
    if B <= 128:
        Bp = _round_up(B, 8)                 # single tile both ways
        return Bp, Bp, Bp
    tk = 256 if B > 256 else 128
    Bp = _round_up(B, tk)
    n = Bp // tk
    tq = tk
    for m in range(n, 0, -1):                # largest tq that divides Bp & fits VMEM
        if n % m:
            continue
        cand = m * tk
        if cand > 1024:
            continue
        if _vmem_estimate(cand, tk, Dp, isz) <= headroom:
            tq = cand
            break
    return tq, tk, Bp


def _supcon_kernel(q_ref, k_ref, labq_ref, labk_ref, o_ref,
                   m_sc, l_sc, s_sc, c_sc, *, inv_temp, batch, tq, tk, padded):
    qi = pl.program_id(0)
    ki = pl.program_id(1)
    last_k = pl.num_programs(1) - 1

    @pl.when(ki == 0)
    def _init():
        m_sc[...] = jnp.full_like(m_sc, _NEG_BIG)
        l_sc[...] = jnp.zeros_like(l_sc)
        s_sc[...] = jnp.zeros_like(s_sc)
        c_sc[...] = jnp.zeros_like(c_sc)

    # (tq, tk) tile of the Gram matrix: contraction on the last dim of both
    # operands (no transpose anywhere), f32 MXU accumulation, 1/T applied in f32.
    adc = jax.lax.dot_general(
        q_ref[...], k_ref[...],
        dimension_numbers=(((1,), (1,)), ((), ())),
        preferred_element_type=jnp.float32) * inv_temp

    lab_eq = labq_ref[...] == labk_ref[...]          # (tq, tk) bool

    def _update(adc_m, pos):
        # Online softmax over valid off-diagonal columns.  NOTE: the running max
        # deliberately excludes the diagonal (unlike torch's logits_max) — the
        # log-prob is shift invariant, and this keeps l >= 1 so the denominator
        # never underflows even at temperature=0.01.
        m_prev = m_sc[...]
        m_new = jnp.maximum(m_prev, jnp.max(adc_m, axis=1, keepdims=True))
        alpha = jnp.exp(m_prev - m_new)
        l_sc[...] = alpha * l_sc[...] + jnp.sum(jnp.exp(adc_m - m_new),
                                                axis=1, keepdims=True)
        m_sc[...] = m_new
        # Positive-pair sums use the raw scaled logits -> no max rescale needed.
        s_sc[...] += jnp.sum(jnp.where(pos, adc_m, 0.0), axis=1, keepdims=True)
        c_sc[...] += jnp.sum(pos.astype(jnp.float32), axis=1, keepdims=True)

    # Only tiles that contain diagonal elements or padded columns need masks.
    row_lo = qi * tq
    col_lo = ki * tk
    has_diag = jnp.logical_and(row_lo < col_lo + tk, col_lo < row_lo + tq)
    if padded:
        needs_mask = jnp.logical_or(has_diag, ki == last_k)
    else:
        needs_mask = has_diag

    @pl.when(needs_mask)
    def _masked():
        row_ids = row_lo + jax.lax.broadcasted_iota(jnp.int32, (tq, 1), 0)
        col_ids = col_lo + jax.lax.broadcasted_iota(jnp.int32, (1, tk), 1)
        lm = row_ids != col_ids                       # drop the diagonal
        if padded:
            lm = jnp.logical_and(lm, col_ids < batch)  # drop padded columns
        adc_m = jnp.where(lm, adc, _NEG_BIG)
        _update(adc_m, jnp.logical_and(lm, lab_eq))

    @pl.when(jnp.logical_not(needs_mask))
    def _fast():
        _update(adc, lab_eq)

    @pl.when(ki == last_k)
    def _finalize():
        c = c_sc[...]
        # sum(mask * log_prob) / sum(mask) = s/c - m - log(l)
        mean_lp = s_sc[...] / jnp.maximum(c, 1.0) - m_sc[...] - jnp.log(l_sc[...])
        valid = c > 0.0
        if padded:
            row_ids = row_lo + jax.lax.broadcasted_iota(jnp.int32, (tq, 1), 0)
            valid = jnp.logical_and(valid, row_ids < batch)
        # Rows with no positive pair contribute 0 (the torch reference would NaN
        # there); padded rows contribute 0.
        o_ref[...] = jnp.where(valid, mean_lp, 0.0)


def supcon_loss(features, labels, temperature=0.01, *, block=None):
    """SupConLoss forward. features: (B, D) float, labels: (B,) int -> f32 scalar."""
    features = jnp.asarray(features)
    if features.dtype not in (jnp.float32, jnp.bfloat16, jnp.float16):
        features = features.astype(jnp.float32)
    B, D = features.shape
    labels = jnp.asarray(labels).astype(jnp.int32).reshape(B)

    Dp = _round_up(D, 128)                   # lane-dense contraction dim
    isz = features.dtype.itemsize
    cap = _vmem_capacity_bytes()
    budget = (cap * 3) // 4                  # ~96 MiB on 128-MiB parts, ~48 MiB on v7x
    tq, tk, Bp = _choose_tiles(B, Dp, isz, budget, block)
    padded = Bp != B

    f = features
    if (Bp != B) or (Dp != D):
        f = jnp.pad(f, ((0, Bp - B), (0, Dp - D)))

    sentinel = jnp.iinfo(jnp.int32).min      # padded rows never match a real label
    lab = labels
    if padded:
        lab = jnp.concatenate([lab, jnp.full((Bp - B,), sentinel, jnp.int32)])
    lab_col = lab.reshape(Bp, 1)
    lab_row = lab.reshape(1, Bp)

    grid = (Bp // tq, Bp // tk)
    kernel = functools.partial(
        _supcon_kernel, inv_temp=float(1.0 / float(temperature)),
        batch=B, tq=tq, tk=tk, padded=padded)

    mean_log_prob_pos = pl.pallas_call(
        kernel,
        grid=grid,
        in_specs=[
            pl.BlockSpec((tq, Dp), lambda i, k: (i, 0)),   # anchor rows (resident over k)
            pl.BlockSpec((tk, Dp), lambda i, k: (k, 0)),   # key rows (contiguous DMA)
            pl.BlockSpec((tq, 1), lambda i, k: (i, 0)),    # row labels
            pl.BlockSpec((1, tk), lambda i, k: (0, k)),    # col labels (tk=Bp or mult. of 128)
        ],
        out_specs=pl.BlockSpec((tq, 1), lambda i, k: (i, 0)),
        out_shape=jax.ShapeDtypeStruct((Bp, 1), jnp.float32),
        scratch_shapes=[pltpu.VMEM((tq, 1), jnp.float32) for _ in range(4)],
        compiler_params=pltpu.CompilerParams(
            dimension_semantics=("parallel", "arbitrary"),
            vmem_limit_bytes=int(budget)),
    )(f, f, lab_col, lab_row)

    return -(jnp.sum(mean_log_prob_pos) / jnp.float32(B))


def _supcon_ref(features, labels, temperature=0.01):
    """Pure-JAX reference faithfully mirroring the PyTorch forward."""
    f = jnp.asarray(features).astype(jnp.float32)
    B = f.shape[0]
    lab = labels.reshape(-1, 1)
    mask = (lab == lab.T).astype(jnp.float32)
    adc = (f @ f.T) / temperature
    logits = adc - jnp.max(adc, axis=1, keepdims=True)
    logits_mask = 1.0 - jnp.eye(B, dtype=jnp.float32)
    mask = mask * logits_mask
    exp_logits = jnp.exp(logits) * logits_mask
    log_prob = logits - jnp.log(exp_logits.sum(1, keepdims=True))
    mean_log_prob_pos = (mask * log_prob).sum(1) / mask.sum(1)
    return -mean_log_prob_pos.mean()


def _make_inputs(key, batch, dim, n_classes, noise=0.05, dtype=jnp.float32):
    """Label-clustered, L2-normalized features so the torch-style reference is
    finite even at temperature=0.01 (positives have high cosine similarity)."""
    kp, kn = jax.random.split(key)
    protos = jax.random.normal(kp, (n_classes, dim), dtype=jnp.float32)
    protos = protos / jnp.linalg.norm(protos, axis=1, keepdims=True)
    labels = jnp.arange(batch, dtype=jnp.int32) % n_classes
    feats = protos[labels] + noise * jax.random.normal(kn, (batch, dim),
                                                       dtype=jnp.float32)
    feats = feats / jnp.linalg.norm(feats, axis=1, keepdims=True)
    return feats.astype(dtype), labels


if __name__ == "__main__":
    key = jax.random.PRNGKey(0)
    k1, k2, k3 = jax.random.split(key, 3)

    # Case 1: tiny single-tile batch.
    f1, l1 = _make_inputs(k1, batch=8, dim=32, n_classes=2)
    ref1 = _supcon_ref(f1, l1, 0.01)
    assert bool(jnp.isfinite(ref1))
    out1 = supcon_loss(f1, l1, temperature=0.01)
    jax.block_until_ready(out1)
    assert jnp.allclose(out1, ref1, rtol=2e-3, atol=2e-3), (out1, ref1)

    # Case 2: unaligned B/D -> row/col/D zero-padding + validity masks.
    f2, l2 = _make_inputs(k2, batch=20, dim=48, n_classes=4)
    ref2 = _supcon_ref(f2, l2, 0.01)
    assert bool(jnp.isfinite(ref2))
    out2 = supcon_loss(f2, l2, temperature=0.01)
    jax.block_until_ready(out2)
    assert jnp.allclose(out2, ref2, rtol=2e-3, atol=2e-3), (out2, ref2)

    # Case 3: default heuristic -> decoupled tq(256) != tk(128), multi column
    # tiles, online-softmax rescale, masked last (padded) column tile.
    f3, l3 = _make_inputs(k3, batch=200, dim=48, n_classes=5)
    ref3 = _supcon_ref(f3, l3, 0.01)
    assert bool(jnp.isfinite(ref3))
    out3 = supcon_loss(f3, l3, temperature=0.01)
    jax.block_until_ready(out3)
    assert jnp.allclose(out3, ref3, rtol=5e-3, atol=5e-3), (out3, ref3)

    # Case 4: forced 128x128 tiling -> (2,2) grid; exercises the unmasked
    # fast-path tile as well as diagonal / padded masked tiles.
    out4 = supcon_loss(f3, l3, temperature=0.01, block=128)
    jax.block_until_ready(out4)
    assert jnp.allclose(out4, ref3, rtol=5e-3, atol=5e-3), (out4, ref3)

    # Case 5: bf16 features on the MXU (f32 accumulation + in-kernel f32 1/T).
    f3b = f3.astype(jnp.bfloat16)
    ref5 = _supcon_ref(f3b, l3, 0.01)
    out5 = supcon_loss(f3b, l3, temperature=0.01)
    jax.block_until_ready(out5)
    assert jnp.allclose(out5, ref5, rtol=2e-2, atol=2e-2), (out5, ref5)

    print("KERNEL_OK")
</pallas_src>

<mosaic_0001>
module attributes {stable_mosaic.version = 11 : i64} {
  func.func @_supcon_kernel(%arg0: i32, %arg1: i32, %arg2: memref<8x128xf32, #tpu.memory_space<vmem>>, %arg3: memref<8x128xf32, #tpu.memory_space<vmem>>, %arg4: memref<8x1xi32, #tpu.memory_space<vmem>>, %arg5: memref<1x8xi32, #tpu.memory_space<vmem>>, %arg6: memref<8x1xf32, #tpu.memory_space<vmem>>, %arg7: memref<8x1xf32, #tpu.memory_space<vmem>>, %arg8: memref<8x1xf32, #tpu.memory_space<vmem>>, %arg9: memref<8x1xf32, #tpu.memory_space<vmem>>, %arg10: memref<8x1xf32, #tpu.memory_space<vmem>>) attributes {dimension_semantics = [#tpu.dimension_semantics<parallel>, #tpu.dimension_semantics<arbitrary>], iteration_bounds = array<i64: 1, 1>, scalar_prefetch = 0 : i64, scratch_operands = 4 : i64, tpu.core_type = #tpu.core_type<tc>, window_params = [{transform_indices = @transform_0, window_bounds = array<i64: 8, 128>}, {transform_indices = @transform_1, window_bounds = array<i64: 8, 128>}, {transform_indices = @transform_2, window_bounds = array<i64: 8, 1>}, {transform_indices = @transform_3, window_bounds = array<i64: 1, 8>}, {transform_indices = @transform_4, window_bounds = array<i64: 8, 1>}]} {
    %c0_i32 = arith.constant 0 : i32
    %0 = arith.cmpi eq, %arg1, %c0_i32 : i32
    %1 = arith.extui %0 : i1 to i32
    %c0_i32_0 = arith.constant 0 : i32
    %2 = arith.cmpi ne, %1, %c0_i32_0 : i32
    scf.if %2 {
      %cst_16 = arith.constant -1.000000e+30 : f32
      %28 = vector.broadcast %cst_16 : f32 to vector<8x1xf32>
      %c0_17 = arith.constant 0 : index
      %c0_18 = arith.constant 0 : index
      %29 = vector.load %arg7[%c0_17, %c0_18] : memref<8x1xf32, #tpu.memory_space<vmem>>, vector<8x1xf32>
      tpu.vector_store %arg7[%c0_17, %c0_18], %28 {strides = array<i32>} : memref<8x1xf32, #tpu.memory_space<vmem>>, vector<8x1xf32>,
      %cst_19 = arith.constant 0.000000e+00 : f32
      %30 = vector.broadcast %cst_19 : f32 to vector<8x1xf32>
      %c0_20 = arith.constant 0 : index
      %c0_21 = arith.constant 0 : index
      %31 = vector.load %arg8[%c0_20, %c0_21] : memref<8x1xf32, #tpu.memory_space<vmem>>, vector<8x1xf32>
      tpu.vector_store %arg8[%c0_20, %c0_21], %30 {strides = array<i32>} : memref<8x1xf32, #tpu.memory_space<vmem>>, vector<8x1xf32>,
      %cst_22 = arith.constant 0.000000e+00 : f32
      %32 = vector.broadcast %cst_22 : f32 to vector<8x1xf32>
      %c0_23 = arith.constant 0 : index
      %c0_24 = arith.constant 0 : index
      %33 = vector.load %arg9[%c0_23, %c0_24] : memref<8x1xf32, #tpu.memory_space<vmem>>, vector<8x1xf32>
      tpu.vector_store %arg9[%c0_23, %c0_24], %32 {strides = array<i32>} : memref<8x1xf32, #tpu.memory_space<vmem>>, vector<8x1xf32>,
      %cst_25 = arith.constant 0.000000e+00 : f32
      %34 = vector.broadcast %cst_25 : f32 to vector<8x1xf32>
      %c0_26 = arith.constant 0 : index
      %c0_27 = arith.constant 0 : index
      %35 = vector.load %arg10[%c0_26, %c0_27] : memref<8x1xf32, #tpu.memory_space<vmem>>, vector<8x1xf32>
      tpu.vector_store %arg10[%c0_26, %c0_27], %34 {strides = array<i32>} : memref<8x1xf32, #tpu.memory_space<vmem>>, vector<8x1xf32>,
    } else {
    }
    %c0 = arith.constant 0 : index
    %c0_1 = arith.constant 0 : index
    %3 = vector.load %arg2[%c0, %c0_1] : memref<8x128xf32, #tpu.memory_space<vmem>>, vector<8x128xf32>
    %c0_2 = arith.constant 0 : index
    %c0_3 = arith.constant 0 : index
    %4 = vector.load %arg3[%c0_2, %c0_3] : memref<8x128xf32, #tpu.memory_space<vmem>>, vector<8x128xf32>
    %cst = arith.constant dense<0.000000e+00> : vector<8x8xf32>
    %5 = tpu.matmul %3, %4, %cst {dimension_numbers = #tpu.dot_dimension_numbers<[1], [1], [0], [0], [0, 0, 1, 0], [], []>} : vector<8x128xf32>, vector<8x128xf32>, vector<8x8xf32> -> vector<8x8xf32>
    %cst_4 = arith.constant 1.000000e+02 : f32
    %6 = vector.broadcast %cst_4 : f32 to vector<8x8xf32>
    %7 = arith.mulf %5, %6 : vector<8x8xf32>
    %c0_5 = arith.constant 0 : index
    %c0_6 = arith.constant 0 : index
    %8 = vector.load %arg4[%c0_5, %c0_6] : memref<8x1xi32, #tpu.memory_space<vmem>>, vector<8x1xi32>
    %c0_7 = arith.constant 0 : index
    %c0_8 = arith.constant 0 : index
    %9 = vector.load %arg5[%c0_7, %c0_8] : memref<1x8xi32, #tpu.memory_space<vmem>>, vector<1x8xi32>
    %10 = vector.broadcast %8 : vector<8x1xi32> to vector<8x8xi32>
    %11 = vector.broadcast %9 : vector<1x8xi32> to vector<8x8xi32>
    %12 = arith.cmpi eq, %10, %11 : vector<8x8xi32>
    %c8_i32 = arith.constant 8 : i32
    %13 = arith.muli %arg0, %c8_i32 : i32
    %c8_i32_9 = arith.constant 8 : i32
    %14 = arith.muli %arg1, %c8_i32_9 : i32
    %c8_i32_10 = arith.constant 8 : i32
    %15 = arith.addi %14, %c8_i32_10 : i32
    %16 = arith.cmpi slt, %13, %15 : i32
    %c8_i32_11 = arith.constant 8 : i32
    %17 = arith.addi %13, %c8_i32_11 : i32
    %18 = arith.cmpi slt, %14, %17 : i32
    %19 = arith.andi %16, %18 : i1
    %20 = arith.extui %19 : i1 to i32
    %c0_i32_12 = arith.constant 0 : i32
    %21 = arith.cmpi ne, %20, %c0_i32_12 : i32
    scf.if %21 {
      %28 = tpu.iota {dimensions = array<i32: 0>} : vector<8x1xi32>
      %29 = vector.broadcast %13 : i32 to vector<8x1xi32>
      %30 = arith.addi %29, %28 : vector<8x1xi32>
      %31 = tpu.iota {dimensions = array<i32: 1>} : vector<1x8xi32>
      %32 = vector.broadcast %14 : i32 to vector<1x8xi32>
      %33 = arith.addi %32, %31 : vector<1x8xi32>
      %34 = vector.broadcast %30 : vector<8x1xi32> to vector<8x8xi32>
      %35 = vector.broadcast %33 : vector<1x8xi32> to vector<8x8xi32>
      %36 = arith.cmpi ne, %34, %35 : vector<8x8xi32>
      %cst_16 = arith.constant -1.000000e+30 : f32
      %37 = vector.broadcast %cst_16 : f32 to vector<8x8xf32>
      %38 = arith.select %36, %7, %37 : vector<8x8xi1>, vector<8x8xf32>
      %39 = arith.andi %36, %12 : vector<8x8xi1>
      %c0_17 = arith.constant 0 : index
      %c0_18 = arith.constant 0 : index
      %40 = vector.load %arg7[%c0_17, %c0_18] : memref<8x1xf32, #tpu.memory_space<vmem>>, vector<8x1xf32>
      %cst_19 = arith.constant dense<0xFF800000> : vector<8xf32>
      %41 = vector.multi_reduction <maximumf>, %38, %cst_19 [1] : vector<8x8xf32> to vector<8xf32>
      %42 = vector.shape_cast %41 : vector<8xf32> to vector<8x1xf32>
      %43 = arith.maximumf %40, %42 : vector<8x1xf32>
      %44 = arith.subf %40, %43 : vector<8x1xf32>
      %45 = math.exp %44 : vector<8x1xf32>
      %c0_20 = arith.constant 0 : index
      %c0_21 = arith.constant 0 : index
      %46 = vector.load %arg8[%c0_20, %c0_21] : memref<8x1xf32, #tpu.memory_space<vmem>>, vector<8x1xf32>
      %47 = arith.mulf %45, %46 : vector<8x1xf32>
      %48 = vector.broadcast %43 : vector<8x1xf32> to vector<8x8xf32>
      %49 = arith.subf %38, %48 : vector<8x8xf32>
      %50 = math.exp %49 : vector<8x8xf32>
      %cst_22 = arith.constant dense<0.000000e+00> : vector<8xf32>
      %51 = vector.multi_reduction <add>, %50, %cst_22 [1] : vector<8x8xf32> to vector<8xf32>
      %52 = vector.shape_cast %51 : vector<8xf32> to vector<8x1xf32>
      %53 = arith.addf %47, %52 : vector<8x1xf32>
      %c0_23 = arith.constant 0 : index
      %c0_24 = arith.constant 0 : index
      %54 = vector.load %arg8[%c0_23, %c0_24] : memref<8x1xf32, #tpu.memory_space<vmem>>, vector<8x1xf32>
      tpu.vector_store %arg8[%c0_23, %c0_24], %53 {strides = array<i32>} : memref<8x1xf32, #tpu.memory_space<vmem>>, vector<8x1xf32>,
      %c0_25 = arith.constant 0 : index
      %c0_26 = arith.constant 0 : index
      %55 = vector.load %arg7[%c0_25, %c0_26] : memref<8x1xf32, #tpu.memory_space<vmem>>, vector<8x1xf32>
      tpu.vector_store %arg7[%c0_25, %c0_26], %43 {strides = array<i32>} : memref<8x1xf32, #tpu.memory_space<vmem>>, vector<8x1xf32>,
      %c0_27 = arith.constant 0 : index
      %c0_28 = arith.constant 0 : index
      %56 = vector.load %arg9[%c0_27, %c0_28] : memref<8x1xf32, #tpu.memory_space<vmem>>, vector<8x1xf32>
      %cst_29 = arith.constant 0.000000e+00 : f32
      %57 = vector.broadcast %cst_29 : f32 to vector<8x8xf32>
      %58 = arith.select %39, %38, %57 : vector<8x8xi1>, vector<8x8xf32>
      %cst_30 = arith.constant dense<0.000000e+00> : vector<8xf32>
      %59 = vector.multi_reduction <add>, %58, %cst_30 [1] : vector<8x8xf32> to vector<8xf32>
      %60 = vector.shape_cast %59 : vector<8xf32> to vector<8x1xf32>
      %61 = arith.addf %56, %60 : vector<8x1xf32>
      %c0_31 = arith.constant 0 : index
      %c0_32 = arith.constant 0 : index
      %62 = vector.load %arg9[%c0_31, %c0_32] : memref<8x1xf32, #tpu.memory_space<vmem>>, vector<8x1xf32>
      tpu.vector_store %arg9[%c0_31, %c0_32], %61 {strides = array<i32>} : memref<8x1xf32, #tpu.memory_space<vmem>>, vector<8x1xf32>,
      %c0_33 = arith.constant 0 : index
      %c0_34 = arith.constant 0 : index
      %63 = vector.load %arg10[%c0_33, %c0_34] : memref<8x1xf32, #tpu.memory_space<vmem>>, vector<8x1xf32>
      %64 = arith.extui %39 : vector<8x8xi1> to vector<8x8xi32>
      %65 = arith.sitofp %64 : vector<8x8xi32> to vector<8x8xf32>
      %cst_35 = arith.constant dense<0.000000e+00> : vector<8xf32>
      %66 = vector.multi_reduction <add>, %65, %cst_35 [1] : vector<8x8xf32> to vector<8xf32>
      %67 = vector.shape_cast %66 : vector<8xf32> to vector<8x1xf32>
      %68 = arith.addf %63, %67 : vector<8x1xf32>
      %c0_36 = arith.constant 0 : index
      %c0_37 = arith.constant 0 : index
      %69 = vector.load %arg10[%c0_36, %c0_37] : memref<8x1xf32, #tpu.memory_space<vmem>>, vector<8x1xf32>
      tpu.vector_store %arg10[%c0_36, %c0_37], %68 {strides = array<i32>} : memref<8x1xf32, #tpu.memory_space<vmem>>, vector<8x1xf32>,
    } else {
    }
    %true = arith.constant true
    %22 = arith.xori %19, %true : i1
    %23 = arith.extui %22 : i1 to i32
    %c0_i32_13 = arith.constant 0 : i32
    %24 = arith.cmpi ne, %23, %c0_i32_13 : i32
    scf.if %24 {
      %c0_16 = arith.constant 0 : index
      %c0_17 = arith.constant 0 : index
      %28 = vector.load %arg7[%c0_16, %c0_17] : memref<8x1xf32, #tpu.memory_space<vmem>>, vector<8x1xf32>
      %cst_18 = arith.constant dense<0xFF800000> : vector<8xf32>
      %29 = vector.multi_reduction <maximumf>, %7, %cst_18 [1] : vector<8x8xf32> to vector<8xf32>
      %30 = vector.shape_cast %29 : vector<8xf32> to vector<8x1xf32>
      %31 = arith.maximumf %28, %30 : vector<8x1xf32>
      %32 = arith.subf %28, %31 : vector<8x1xf32>
      %33 = math.exp %32 : vector<8x1xf32>
      %c0_19 = arith.constant 0 : index
      %c0_20 = arith.constant 0 : index
      %34 = vector.load %arg8[%c0_19, %c0_20] : memref<8x1xf32, #tpu.memory_space<vmem>>, vector<8x1xf32>
      %35 = arith.mulf %33, %34 : vector<8x1xf32>
      %36 = vector.broadcast %31 : vector<8x1xf32> to vector<8x8xf32>
      %37 = arith.subf %7, %36 : vector<8x8xf32>
      %38 = math.exp %37 : vector<8x8xf32>
      %cst_21 = arith.constant dense<0.000000e+00> : vector<8xf32>
      %39 = vector.multi_reduction <add>, %38, %cst_21 [1] : vector<8x8xf32> to vector<8xf32>
      %40 = vector.shape_cast %39 : vector<8xf32> to vector<8x1xf32>
      %41 = arith.addf %35, %40 : vector<8x1xf32>
      %c0_22 = arith.constant 0 : index
      %c0_23 = arith.constant 0 : index
      %42 = vector.load %arg8[%c0_22, %c0_23] : memref<8x1xf32, #tpu.memory_space<vmem>>, vector<8x1xf32>
      tpu.vector_store %arg8[%c0_22, %c0_23], %41 {strides = array<i32>} : memref<8x1xf32, #tpu.memory_space<vmem>>, vector<8x1xf32>,
      %c0_24 = arith.constant 0 : index
      %c0_25 = arith.constant 0 : index
      %43 = vector.load %arg7[%c0_24, %c0_25] : memref<8x1xf32, #tpu.memory_space<vmem>>, vector<8x1xf32>
      tpu.vector_store %arg7[%c0_24, %c0_25], %31 {strides = array<i32>} : memref<8x1xf32, #tpu.memory_space<vmem>>, vector<8x1xf32>,
      %c0_26 = arith.constant 0 : index
      %c0_27 = arith.constant 0 : index
      %44 = vector.load %arg9[%c0_26, %c0_27] : memref<8x1xf32, #tpu.memory_space<vmem>>, vector<8x1xf32>
      %cst_28 = arith.constant 0.000000e+00 : f32
      %45 = vector.broadcast %cst_28 : f32 to vector<8x8xf32>
      %46 = arith.select %12, %7, %45 : vector<8x8xi1>, vector<8x8xf32>
      %cst_29 = arith.constant dense<0.000000e+00> : vector<8xf32>
      %47 = vector.multi_reduction <add>, %46, %cst_29 [1] : vector<8x8xf32> to vector<8xf32>
      %48 = vector.shape_cast %47 : vector<8xf32> to vector<8x1xf32>
      %49 = arith.addf %44, %48 : vector<8x1xf32>
      %c0_30 = arith.constant 0 : index
      %c0_31 = arith.constant 0 : index
      %50 = vector.load %arg9[%c0_30, %c0_31] : memref<8x1xf32, #tpu.memory_space<vmem>>, vector<8x1xf32>
      tpu.vector_store %arg9[%c0_30, %c0_31], %49 {strides = array<i32>} : memref<8x1xf32, #tpu.memory_space<vmem>>, vector<8x1xf32>,
      %c0_32 = arith.constant 0 : index
      %c0_33 = arith.constant 0 : index
      %51 = vector.load %arg10[%c0_32, %c0_33] : memref<8x1xf32, #tpu.memory_space<vmem>>, vector<8x1xf32>
      %52 = arith.extui %12 : vector<8x8xi1> to vector<8x8xi32>
      %53 = arith.sitofp %52 : vector<8x8xi32> to vector<8x8xf32>
      %cst_34 = arith.constant dense<0.000000e+00> : vector<8xf32>
      %54 = vector.multi_reduction <add>, %53, %cst_34 [1] : vector<8x8xf32> to vector<8xf32>
      %55 = vector.shape_cast %54 : vector<8xf32> to vector<8x1xf32>
      %56 = arith.addf %51, %55 : vector<8x1xf32>
      %c0_35 = arith.constant 0 : index
      %c0_36 = arith.constant 0 : index
      %57 = vector.load %arg10[%c0_35, %c0_36] : memref<8x1xf32, #tpu.memory_space<vmem>>, vector<8x1xf32>
      tpu.vector_store %arg10[%c0_35, %c0_36], %56 {strides = array<i32>} : memref<8x1xf32, #tpu.memory_space<vmem>>, vector<8x1xf32>,
    } else {
    }
    %c0_i32_14 = arith.constant 0 : i32
    %25 = arith.cmpi eq, %arg1, %c0_i32_14 : i32
    %26 = arith.extui %25 : i1 to i32
    %c0_i32_15 = arith.constant 0 : i32
    %27 = arith.cmpi ne, %26, %c0_i32_15 : i32
    scf.if %27 {
      %c0_16 = arith.constant 0 : index
      %c0_17 = arith.constant 0 : index
      %28 = vector.load %arg10[%c0_16, %c0_17] : memref<8x1xf32, #tpu.memory_space<vmem>>, vector<8x1xf32>
      %c0_18 = arith.constant 0 : index
      %c0_19 = arith.constant 0 : index
      %29 = vector.load %arg9[%c0_18, %c0_19] : memref<8x1xf32, #tpu.memory_space<vmem>>, vector<8x1xf32>
      %cst_20 = arith.constant 1.000000e+00 : f32
      %30 = vector.broadcast %cst_20 : f32 to vector<8x1xf32>
      %31 = arith.maximumf %28, %30 : vector<8x1xf32>
      %32 = arith.divf %29, %31 : vector<8x1xf32>
      %c0_21 = arith.constant 0 : index
      %c0_22 = arith.constant 0 : index
      %33 = vector.load %arg7[%c0_21, %c0_22] : memref<8x1xf32, #tpu.memory_space<vmem>>, vector<8x1xf32>
      %34 = arith.subf %32, %33 : vector<8x1xf32>
      %c0_23 = arith.constant 0 : index
      %c0_24 = arith.constant 0 : index
      %35 = vector.load %arg8[%c0_23, %c0_24] : memref<8x1xf32, #tpu.memory_space<vmem>>, vector<8x1xf32>
      %36 = math.log %35 : vector<8x1xf32>
      %37 = arith.subf %34, %36 : vector<8x1xf32>
      %cst_25 = arith.constant 0.000000e+00 : f32
      %38 = vector.broadcast %cst_25 : f32 to vector<8x1xf32>
      %39 = arith.cmpf ogt, %28, %38 : vector<8x1xf32>
      %cst_26 = arith.constant 0.000000e+00 : f32
      %40 = vector.broadcast %cst_26 : f32 to vector<8x1xf32>
      %41 = arith.select %39, %37, %40 : vector<8x1xi1>, vector<8x1xf32>
      %c0_27 = arith.constant 0 : index
      %c0_28 = arith.constant 0 : index
      %42 = vector.load %arg6[%c0_27, %c0_28] : memref<8x1xf32, #tpu.memory_space<vmem>>, vector<8x1xf32>
      tpu.vector_store %arg6[%c0_27, %c0_28], %41 {strides = array<i32>} : memref<8x1xf32, #tpu.memory_space<vmem>>, vector<8x1xf32>,
    } else {
    }
    return
  }
  func.func @transform_0(%arg0: i32, %arg1: i32) -> (i32, i32) {
    %c0_i32 = arith.constant 0 : i32
    %c0_i32_0 = arith.constant 0 : i32
    return %arg0, %c0_i32 : i32, i32
  }
  func.func @transform_1(%arg0: i32, %arg1: i32) -> (i32, i32) {
    %c0_i32 = arith.constant 0 : i32
    %c0_i32_0 = arith.constant 0 : i32
    return %arg1, %c0_i32 : i32, i32
  }
  func.func @transform_2(%arg0: i32, %arg1: i32) -> (i32, i32) {
    %c0_i32 = arith.constant 0 : i32
    %c0_i32_0 = arith.constant 0 : i32
    return %arg0, %c0_i32 : i32, i32
  }
  func.func @transform_3(%arg0: i32, %arg1: i32) -> (i32, i32) {
    %c0_i32 = arith.constant 0 : i32
    %c0_i32_0 = arith.constant 0 : i32
    return %c0_i32, %arg1 : i32, i32
  }
  func.func @transform_4(%arg0: i32, %arg1: i32) -> (i32, i32) {
    %c0_i32 = arith.constant 0 : i32
    %c0_i32_0 = arith.constant 0 : i32
    return %arg0, %c0_i32 : i32, i32
  }
}

</mosaic_0001>

<bundles_post_ra>
// kernel: tpu_custom_call.1
= control target key start
LH: loop header
LB: loop body
LE: loop exit
PB: predicated region body
PF: predicated region fallthrough
CT: control target
= control target key end

     0   :  { %9 = vsyncpa [#allocation7], 0  ;;  %s297_s15 = smov [#allocation6]   ;;  %s363_s0 = inlined_call_operand.vmem [shape: f32[8,128], index: 0, kind: input, shape index: {}]   ;;  %s364_s1 = inlined_call_operand.hbm [shape: f32[8,128], index: 1, kind: input, shape index: {}]   ;;  %s365_s2 = inlined_call_operand.vmem [shape: s32[8,1], index: 2, kind: input, shape index: {}]   ;;  %s366_s3 = inlined_call_operand.vmem [shape: s32[1,8], index: 3, kind: input, shape index: {}]   ;;  %s367_s4 = inlined_call_operand.vmem [shape: f32[8,1], index: 4, kind: output, shape index: {}]  }
   0x1   :  { %s18_s16 = sshll.u32 %s297_s15, 4  ;;  %s19_s16 = int_to_ptr.vmem [resolvable:$true] %s18_s16 }
   0x2   :  { %s283_s17 = scalar_lea.vmem %s19_s16, 128  ;;  %p288_p1 = scmp.lt.s32.totalorder %s19_s16, %s19_s16 }
   0x3   :  { %p284_p0 = scmp.ne.s32.totalorder %s19_s16, %s283_s17  ;;  %p289_p2 = scmp.lt.s32.totalorder %s283_s17, %s283_s17 }
   0x5   :  { %p290_p3 = por %p289_p2, %p288_p1 }
   0x7   :  { %p291_p4 = pnand %p290_p3, %p284_p0 }
   0x9   :  { %294 = shalt.err (!%p291_p4)
}
   0xa   :  { %21 = dma.hbm_to_vmem [thread:$0]  %s364_s1, 128, %s19_s16, [#allocation7]  }
   0xb   :  { %295 = dma.done.wait [#allocation7], 128  }
   0xc   :  { %296 = vsyncadd [#allocation7], 4294967168  ;;  %v298_v0 = vmov 0.0   ;;  %vm299_vm0 = vmmov 0   ;;  %v300_v1 = vmov 0   ;;  %v39_v2 = vld [vmem:[#allocation6] sm:$0xff]  ;;  %v131_v6 = vlaneseq }
   0xd   :  { %255 = vmatprep.subr.mxu0 %v298_v0  ;;  %257 = vmatprep.mubr.msk.f32.mxu0 %vm299_vm0, %v298_v0  ;;  %v111_v3 = vld [vmem:[%s365_s2] sm:$0xff]  ;;  %vm33_vm1 = vcmask 7168   ;;  %v301_v5 = vmov -1e+30   ;;  %vm143_vm3 = vcmask 64512  }
   0xe   :  { %266 = vset.pattern.permute.xlu1 %v300_v1  ;;  %265 = vset.pattern.permute.xlu0 %v300_v1  ;;  %v38_v4 = vld [vmem:[%s363_s0] sm:$0xff]  ;;  %34 = vst.msk [vmem:[#allocation2] sm:$0xff] %vm33_vm1, %v301_v5  ;;  %35 = vst.msk [vmem:[#allocation3] sm:$0xff] %vm33_vm1, %v298_v0  ;;  %v132_v7 = vshrl.u32 %v131_v6, 7  ;;  %v136_v8 = vand.u32 127, %v131_v6 }
   0xf   :  { %256 = vmatpush3.xpose.msra.mxu0 %v39_v2  ;;  %114 = vperm.xlu1 %266, %v111_v3   ;;  %36 = vst.msk [vmem:[#allocation4] sm:$0xff] %vm33_vm1, %v298_v0  ;;  %37 = vst.msk [vmem:[#allocation5] sm:$0xff] %vm33_vm1, %v298_v0  ;;  %v250_v14 = vld [vmem:[%s366_s3] ss:$0 sm:$0xff] }
  0x10   :  { %vm139_vm2 = vcmp.ne.s32.totalorder %v132_v7, %v136_v8 }
  0x12   :  { %258 = vmatmul.mubr.f32.vlgmr.msra.gmra.mxu0 %v38_v4 }
  0x15   :  { %v142_v16 = vld [vmem:[#allocation2] sm:$0xff]  ;;  %v151_v35 = vld [vmem:[#allocation3] sm:$0xff] }
  0x16   :  { %v175_v26 = vld [vmem:[#allocation5] sm:$0xff]  ;;  %v168_v41 = vld [vmem:[#allocation4] sm:$0xff] }
  0x8a   :  { %v115_v15 = vpop.permute.xlu1 %114 }
  0x8b   :  { %vm120_vm4 = vcmp.eq.s32.totalorder %v115_v15, %v250_v14 }
  0x8c   :  { %vm344_vm5 = vmand %vm139_vm2, %vm120_vm4 }
  0x8d   :  { %v251_v21 = vsel %vm344_vm5, 1.0, %v298_v0 }
  0x8e   :  { %v178_v22 = vsel %vm143_vm3, %v251_v21, 0.0 }
  0x8f   :  { %179 = vadd.xlane.f32.xlu1 %v178_v22 }
  0xd2   :  { %v106_v9 = vpop.f32.mrf.mxu0 }
  0xd3   :  { %v110_v10 = vmul.f32 100.0, %v106_v9 }
  0xd4   :  { %v259_v11 = vpop.f32.mrf.mxu0 }
  0xd5   :  { %v140_v12 = vsel %vm139_vm2, %v110_v10, -1e+30 }
  0xd6   :  { %v144_v13 = vsel %vm143_vm3, %v140_v12, -inf  ;;  %v169_v31 = vsel %vm344_vm5, %v140_v12, 0.0 }
  0xd7   :  { %145 = vmax.xlane.f32.xlu0 %v144_v13  ;;  %v170_v32 = vsel %vm143_vm3, %v169_v31, 0.0 }
 0x118   :  { %v180_v27 = vpop.xlane.xlu1 %179 }
 0x119   :  { %v181_v28 = vadd.f32 %v180_v27, %v175_v26 }
 0x11b   :  { %182 = vst.msk [vmem:[#allocation5] sm:$0xff] %vm33_vm1, %v181_v28 }
 0x122   :  { %v230_v36 = vld [vmem:[#allocation5] sm:$0xff] }
 0x123   :  { %v232_v39 = vmax.f32 %v230_v36, 1.0  ;;  %vm241_vm6 = vcmp.gt.f32.partialorder %v230_v36, 0.0 }
 0x160   :  { %v146_v17 = vpop.xlane.xlu0 %145 }
 0x161   :  { %v147_v18 = vmax.f32 %v142_v16, %v146_v17 }
 0x163   :  { %v148_v20 = vsub.f32 %v142_v16, %v147_v18  ;;  %167 = vst.msk [vmem:[#allocation2] sm:$0xff] %vm33_vm1, %v147_v18  ;;  %155 = vperm.xlu0 %265, %v147_v18  }
 0x165   :  { %v149_v33 = vmul.f32 1.442695, %v148_v20 }
 0x16a   :  { %v235_v49 = vld [vmem:[#allocation2] sm:$0xff] }
 0x1de   :  { %v156_v23 = vpop.permute.xlu0 %155 }
 0x1df   :  { %v158_v24 = vsub.f32 %v140_v12, %v156_v23 }
 0x1e1   :  { %v159_v25 = vmul.f32 1.442695, %v158_v24 }
 0x1e3   :  { %267 = vpow2.f32 %v159_v25 }
 0x1e4   :  { %269 = vpow2.f32 %v149_v33 }
 0x1e5   :  { %271 = vrcp.f32 %v232_v39 }
 0x1f0   :  { %v268_v29 = vpop.eup %267 }
 0x1f1   :  { %v161_v30 = vsel %vm143_vm3, %v268_v29, 0.0  ;;  %v270_v34 = vpop.eup %269 }
 0x1f2   :  { %162 = vadd.xlane.f32.xlu1 %v161_v30  ;;  %v152_v37 = vmul.f32 %v270_v34, %v151_v35  ;;  %v272_v45 = vpop.eup %271 }
 0x1f6   :  { %171 = vadd.xlane.f32.xlu1 %v170_v32 }
 0x27b   :  { %v163_v38 = vpop.xlane.xlu1 %162 }
 0x27c   :  { %v164_v40 = vadd.f32 %v163_v38, %v152_v37 }
 0x27e   :  { %166 = vst.msk [vmem:[#allocation3] sm:$0xff] %vm33_vm1, %v164_v40 }
 0x27f   :  { %v172_v42 = vpop.xlane.xlu1 %171 }
 0x280   :  { %v173_v43 = vadd.f32 %v172_v42, %v168_v41 }
 0x282   :  { %174 = vst.msk [vmem:[#allocation4] sm:$0xff] %vm33_vm1, %v173_v43 }
 0x285   :  { %v237_v44 = vld [vmem:[#allocation3] sm:$0xff] }
 0x286   :  { %273 = vlog2.f32 %v237_v44 }
 0x289   :  { %v231_v46 = vld [vmem:[#allocation4] sm:$0xff] }
 0x28a   :  { %v234_v47 = vmul.f32 %v272_v45, %v231_v46 }
 0x28c   :  { %v236_v51 = vsub.f32 %v234_v47, %v235_v49 }
 0x293   :  { %v274_v48 = vpop.eup %273 }
 0x294   :  { %v239_v50 = vmul.f32 0.6931472, %v274_v48 }
 0x296   :  { %v240_v52 = vsub.f32 %v236_v51, %v239_v50 }
 0x298   :  { %v242_v53 = vsel %vm241_vm6, %v240_v52, 0.0 }
 0x299   :  { %244 = vst.msk [vmem:[%s367_s4] sm:$0xff] %vm33_vm1, %v242_v53 }
 0x29a   :  { %249 = vsyncpa [#allocation7], 1 }

</bundles_post_ra>
